<compile_context>
chip_gen: v5e
topology: v5e:2x2
jax: 0.10.0
libtpu: 0.0.40
codegen_flags: <defaults>
</compile_context>

<pallas_src>
import functools

import jax
import jax.numpy as jnp
from jax.experimental import pallas as pl
from jax.experimental.pallas import tpu as pltpu

ALPHA = 0.25
GAMMA = 2          # integer gamma: lowered as an explicit square below
EPS = 1e-07

# Total live VMEM footprint budgeted per grid step (inputs + temporaries).
_VMEM_FOOTPRINT_BUDGET = 32 * 1024 * 1024
# Explicit scoped-VMEM limit: safe on v5e/v6e (128 MiB physical) and v7x (64 MiB).
_VMEM_LIMIT_BYTES = 48 * 1024 * 1024


def _focal_loss_kernel(x_ref, t_ref, o_ref, *, batch_size):
    """One batch tile: (TB, C) logits + (TB, 1) labels -> (1, 1) partial sum."""
    i = pl.program_id(0)
    x = x_ref[...].astype(jnp.float32)            # (TB, C) upcast in-kernel (bf16 OK)
    t = t_ref[...]                                # (TB, 1) int32
    TB, C = x.shape

    # Target-class logit, extracted BEFORE the exp so the XLU masked-reduce can
    # overlap the EUP exp chain instead of serializing behind it.
    col = jax.lax.broadcasted_iota(jnp.int32, (TB, C), 1)
    x_t = jnp.sum(jnp.where(col == t, x, 0.0), axis=-1, keepdims=True)   # (TB, 1)

    # Row-wise numerically-stable softmax pieces (only B*C transcendental: exp).
    m = jnp.max(x, axis=-1, keepdims=True)        # (TB, 1)
    e = jnp.exp(x - m)                            # (TB, C)
    denom = jnp.sum(e, axis=-1, keepdims=True)    # (TB, 1)

    # p_t = softmax(x)[target]; TB exps/divides -- negligible, exact divide to
    # match the reference numerics.
    p_t = jnp.exp(x_t - m) / denom                # (TB, 1)
    p_t = jnp.clip(p_t, EPS, 1.0 - EPS)           # matches torch clamp(eps, 1-eps)

    # alpha * (-log p_t) * (1 - p_t)^2  -- explicit square, never a generic pow.
    one_m = 1.0 - p_t
    loss = (-ALPHA) * jnp.log(p_t) * one_m * one_m

    # Mask padded rows of a (possibly ragged) last tile.  Garbage in padded rows
    # is confined to those rows (all ops above are row-wise) and jnp.where is a
    # true select, so NaN/Inf cannot leak into valid rows.  O(TB) cost only.
    row = jax.lax.broadcasted_iota(jnp.int32, (TB, 1), 0) + i * TB
    loss = jnp.where(row < batch_size, loss, 0.0)

    o_ref[0, 0] = jnp.sum(loss)                   # per-block partial sum


def _pick_block_rows(batch, classes, itemsize):
    """Largest batch tile whose total live VMEM footprint fits the budget.

    Per-row footprint:
      2 * C * itemsize        double-buffered logits block (input dtype)
      4 * C * 4               ~4 f32 (TB, C) in-kernel temporaries (upcast, x-m,
                              e, iota/select)
      2 * 128 * 4             double-buffered (tb, 1) int32 label block, which
                              is padded to 128 lanes in VMEM
    """
    per_row = 2 * classes * itemsize + 4 * classes * 4 + 2 * 128 * 4
    rows = _VMEM_FOOTPRINT_BUDGET // per_row
    rows = max(8, (rows // 8) * 8)                # multiple of 8: legal tile

    if batch <= rows:
        # Whole batch fits one tile.  For large batches still split in two so
        # the "parallel" grid axis can feed both v7x TensorCores.
        if batch >= 2048:
            half = -(-batch // 2)
            half = -(-half // 8) * 8              # round up to multiple of 8
            if half < batch:
                return half
        return batch                              # single block == full dim: legal
    return rows


def focal_loss(logits, target, *, block_rows=None):
    """logits: (B, C) float32/bfloat16 logits; target: (B, 1) integer class ids
    in [0, C).

    Returns scalar float32: sum(focal_loss) / B, matching the PyTorch module.
    bf16 logits are DMA'd as bf16 (half the HBM bytes -- the main v5e lever)
    and upcast inside the kernel.  `block_rows` is for testing only.
    """
    assert logits.ndim == 2 and target.shape == (logits.shape[0], 1)
    B, C = logits.shape
    tb = block_rows if block_rows is not None else _pick_block_rows(
        B, C, jnp.dtype(logits.dtype).itemsize)
    num_blocks = (B + tb - 1) // tb

    partials = pl.pallas_call(
        functools.partial(_focal_loss_kernel, batch_size=B),
        out_shape=jax.ShapeDtypeStruct((num_blocks, 1), jnp.float32),
        grid=(num_blocks,),
        in_specs=[
            pl.BlockSpec((tb, C), lambda i: (i, 0)),   # logits tile (VMEM, auto-pipelined)
            pl.BlockSpec((tb, 1), lambda i: (i, 0)),   # labels tile (VMEM, lane-padded; budgeted)
        ],
        # One scalar partial per block -> the batch axis can be "parallel"
        # (megacore sharding on v7x; neutral on single-TC v5e/v6e).
        out_specs=pl.BlockSpec((1, 1), lambda i: (i, 0), memory_space=pltpu.SMEM),
        compiler_params=pltpu.CompilerParams(
            dimension_semantics=("parallel",),
            vmem_limit_bytes=_VMEM_LIMIT_BYTES,
        ),
    )(logits, target.astype(jnp.int32))

    return jnp.sum(partials) / jnp.float32(B)


def _focal_loss_ref(logits, target):
    """Pure-JAX reference mirroring the PyTorch forward exactly."""
    B, C = logits.shape
    y = jax.nn.one_hot(target[:, 0], C, dtype=jnp.float32)
    p = jax.nn.softmax(logits.astype(jnp.float32), axis=-1)
    p = jnp.clip(p, EPS, 1.0 - EPS)
    loss = -1.0 * y * jnp.log(p)
    loss = ALPHA * loss * (1.0 - p) ** GAMMA
    return jnp.sum(loss) / B


if __name__ == "__main__":
    key = jax.random.PRNGKey(0)
    k1, k2, k3, k4 = jax.random.split(key, 4)

    # Small primary shape: batch=8, classes=32 (single full-batch tile).
    B, C = 8, 32
    logits = jax.random.normal(k1, (B, C), dtype=jnp.float32)
    target = jax.random.randint(k2, (B, 1), 0, C, dtype=jnp.int32)
    out = jax.block_until_ready(focal_loss(logits, target))
    ref = _focal_loss_ref(logits, target)
    assert jnp.allclose(out, ref, rtol=1e-5, atol=1e-6), (out, ref)

    # Ragged-tile check: B not a multiple of block_rows exercises the padded-row
    # masking path (forced small tile via block_rows).
    B2, C2 = 20, 32
    logits2 = jax.random.normal(k3, (B2, C2), dtype=jnp.float32)
    target2 = jax.random.randint(k4, (B2, 1), 0, C2, dtype=jnp.int32)
    out2 = jax.block_until_ready(focal_loss(logits2, target2, block_rows=8))
    ref2 = _focal_loss_ref(logits2, target2)
    assert jnp.allclose(out2, ref2, rtol=1e-5, atol=1e-6), (out2, ref2)

    print("KERNEL_OK")
</pallas_src>

<mosaic_0001>
module attributes {stable_mosaic.version = 11 : i64} {
  func.func @_focal_loss_kernel(%arg0: i32, %arg1: memref<8x32xf32, #tpu.memory_space<vmem>>, %arg2: memref<8x1xi32, #tpu.memory_space<vmem>>, %arg3: memref<1x1xf32, #tpu.memory_space<smem>>) attributes {dimension_semantics = [#tpu.dimension_semantics<parallel>], iteration_bounds = array<i64: 1>, scalar_prefetch = 0 : i64, scratch_operands = 0 : i64, tpu.core_type = #tpu.core_type<tc>, window_params = [{transform_indices = @transform_0, window_bounds = array<i64: 8, 32>}, {transform_indices = @transform_1, window_bounds = array<i64: 8, 1>}, {transform_indices = @transform_2, window_bounds = array<i64: 1, 1>}]} {
    %c0 = arith.constant 0 : index
    %c0_0 = arith.constant 0 : index
    %0 = vector.load %arg1[%c0, %c0_0] : memref<8x32xf32, #tpu.memory_space<vmem>>, vector<8x32xf32>
    %c0_1 = arith.constant 0 : index
    %c0_2 = arith.constant 0 : index
    %1 = vector.load %arg2[%c0_1, %c0_2] : memref<8x1xi32, #tpu.memory_space<vmem>>, vector<8x1xi32>
    %2 = tpu.iota {dimensions = array<i32: 1>} : vector<8x32xi32>
    %3 = vector.broadcast %1 : vector<8x1xi32> to vector<8x32xi32>
    %4 = arith.cmpi eq, %2, %3 : vector<8x32xi32>
    %cst = arith.constant 0.000000e+00 : f32
    %5 = vector.broadcast %cst : f32 to vector<8x32xf32>
    %6 = arith.select %4, %0, %5 : vector<8x32xi1>, vector<8x32xf32>
    %cst_3 = arith.constant dense<0.000000e+00> : vector<8xf32>
    %7 = vector.multi_reduction <add>, %6, %cst_3 [1] : vector<8x32xf32> to vector<8xf32>
    %8 = vector.shape_cast %7 : vector<8xf32> to vector<8x1xf32>
    %cst_4 = arith.constant dense<0xFF800000> : vector<8xf32>
    %9 = vector.multi_reduction <maximumf>, %0, %cst_4 [1] : vector<8x32xf32> to vector<8xf32>
    %10 = vector.shape_cast %9 : vector<8xf32> to vector<8x1xf32>
    %11 = vector.broadcast %10 : vector<8x1xf32> to vector<8x32xf32>
    %12 = arith.subf %0, %11 : vector<8x32xf32>
    %13 = math.exp %12 : vector<8x32xf32>
    %cst_5 = arith.constant dense<0.000000e+00> : vector<8xf32>
    %14 = vector.multi_reduction <add>, %13, %cst_5 [1] : vector<8x32xf32> to vector<8xf32>
    %15 = vector.shape_cast %14 : vector<8xf32> to vector<8x1xf32>
    %16 = arith.subf %8, %10 : vector<8x1xf32>
    %17 = math.exp %16 : vector<8x1xf32>
    %18 = arith.divf %17, %15 : vector<8x1xf32>
    %cst_6 = arith.constant 1.000000e-07 : f32
    %cst_7 = arith.constant 0.99999988 : f32
    %19 = vector.broadcast %cst_6 : f32 to vector<8x1xf32>
    %20 = arith.maximumf %19, %18 : vector<8x1xf32>
    %21 = vector.broadcast %cst_7 : f32 to vector<8x1xf32>
    %22 = arith.minimumf %21, %20 : vector<8x1xf32>
    %cst_8 = arith.constant 1.000000e+00 : f32
    %23 = vector.broadcast %cst_8 : f32 to vector<8x1xf32>
    %24 = arith.subf %23, %22 : vector<8x1xf32>
    %25 = math.log %22 : vector<8x1xf32>
    %cst_9 = arith.constant -2.500000e-01 : f32
    %26 = vector.broadcast %cst_9 : f32 to vector<8x1xf32>
    %27 = arith.mulf %26, %25 : vector<8x1xf32>
    %28 = arith.mulf %27, %24 : vector<8x1xf32>
    %29 = arith.mulf %28, %24 : vector<8x1xf32>
    %30 = tpu.iota {dimensions = array<i32: 0>} : vector<8x1xi32>
    %c8_i32 = arith.constant 8 : i32
    %31 = arith.muli %arg0, %c8_i32 : i32
    %32 = vector.broadcast %31 : i32 to vector<8x1xi32>
    %33 = arith.addi %30, %32 : vector<8x1xi32>
    %c8_i32_10 = arith.constant 8 : i32
    %34 = vector.broadcast %c8_i32_10 : i32 to vector<8x1xi32>
    %35 = arith.cmpi slt, %33, %34 : vector<8x1xi32>
    %cst_11 = arith.constant 0.000000e+00 : f32
    %36 = vector.broadcast %cst_11 : f32 to vector<8x1xf32>
    %37 = arith.select %35, %29, %36 : vector<8x1xi1>, vector<8x1xf32>
    %38 = vector.shape_cast %37 : vector<8x1xf32> to vector<1x8x1xf32>
    %cst_12 = arith.constant dense<0.000000e+00> : vector<1xf32>
    %39 = vector.multi_reduction <add>, %38, %cst_12 [1, 2] : vector<1x8x1xf32> to vector<1xf32>
    %40 = vector.shape_cast %39 : vector<1xf32> to vector<1x1x1xf32>
    %41 = vector.extract %40[0, 0, 0] : f32 from vector<1x1x1xf32>
    %c0_13 = arith.constant 0 : index
    %c0_14 = arith.constant 0 : index
    %42 = memref.load %arg3[%c0_13, %c0_14] : memref<1x1xf32, #tpu.memory_space<smem>>
    memref.store %41, %arg3[%c0_13, %c0_14] : memref<1x1xf32, #tpu.memory_space<smem>>
    return
  }
  func.func @transform_0(%arg0: i32) -> (i32, i32) {
    %c0_i32 = arith.constant 0 : i32
    %c0_i32_0 = arith.constant 0 : i32
    return %arg0, %c0_i32 : i32, i32
  }
  func.func @transform_1(%arg0: i32) -> (i32, i32) {
    %c0_i32 = arith.constant 0 : i32
    %c0_i32_0 = arith.constant 0 : i32
    return %arg0, %c0_i32 : i32, i32
  }
  func.func @transform_2(%arg0: i32) -> (i32, i32) {
    %c0_i32 = arith.constant 0 : i32
    %c0_i32_0 = arith.constant 0 : i32
    return %arg0, %c0_i32 : i32, i32
  }
}

</mosaic_0001>

<bundles_post_ra>
// kernel: tpu_custom_call.1
= control target key start
LH: loop header
LB: loop body
LE: loop exit
PB: predicated region body
PF: predicated region fallthrough
CT: control target
= control target key end

     0   :  { %vm21_vm0 = vcmask 261120   ;;  %s151_s0 = inlined_call_operand.vmem [shape: f32[8,32], index: 0, kind: input, shape index: {}]   ;;  %s152_s1 = inlined_call_operand.vmem [shape: s32[8,1], index: 1, kind: input, shape index: {}]   ;;  %s153_s2 = inlined_call_operand.hbm [shape: f32[1,1], index: 2, kind: output, shape index: {}]  }
   0x1   :  { %v12_v0 = vld [vmem:[%s151_s0] sm:$0xff] }
   0x2   :  { %7 = vsyncpa [#allocation3], 0  ;;  %v25_v1 = vsel %vm21_vm0, %v12_v0, -inf  ;;  %v122_v2 = vmov 0   ;;  %v13_v3 = vld [vmem:[%s152_s1] sm:$0xff]  ;;  %v14_v9 = vlaneseq  ;;  %vm67_vm6 = vcmask 7168  }
   0x3   :  { %99 = vset.pattern.permute.xlu0 %v122_v2  ;;  %s85_s13 = sshll.u32 %s153_s2, 4  ;;  %s123_s15 = smov [#allocation2]   ;;  %s86_s13 = int_to_ptr.hbm [resolvable:$true] %s85_s13 }
   0x4   :  { %26 = vmax.xlane.f32.xlu0 %v25_v1  ;;  %v15_v10 = vand.u32 127, %v14_v9 }
  0x18   :  { %17 = vperm.xlu0 %99, %v13_v3  }
  0x77   :  { %v27_v4 = vpop.xlane.xlu0 %26 }
  0x78   :  { %v28_v5 = vsub.f32 %v12_v0, %v27_v4 }
  0x7a   :  { %v29_v6 = vmul.f32 1.442695, %v28_v5 }
  0x7c   :  { %100 = vpow2.f32 %v29_v6 }
  0x82   :  { %v101_v7 = vpop.eup %100 }
  0x83   :  { %v31_v8 = vsel %vm21_vm0, %v101_v7, 0.0 }
  0x84   :  { %32 = vadd.xlane.f32.xlu1 %v31_v8 }
  0x8a   :  { %v18_v11 = vpop.permute.xlu0 %17 }
  0x8b   :  { %vm19_vm1 = vcmp.eq.s32.totalorder %v15_v10, %v18_v11 }
  0x8c   :  { %v20_v12 = vsel %vm19_vm1, %v12_v0, 0.0 }
  0x8d   :  { %v22_v13 = vsel %vm21_vm0, %v20_v12, 0.0 }
  0x8e   :  { %23 = vadd.xlane.f32.xlu1 %v22_v13 }
  0xf7   :  { %v33_v14 = vpop.xlane.xlu1 %32 }
  0xf8   :  { %102 = vrcp.f32 %v33_v14  ;;  %v48_v23 = vand.u32 2147483648, %v33_v14  ;;  %vm42_vm3 = vweird.f32 %v33_v14  ;;  %v46_v24 = vand.u32 2147483647, %v33_v14 }
  0xfa   :  { %v49_v26 = vor.u32 1.1754944e-38, %v48_v23  ;;  %vm47_vm5 = vcmp.eq.f32.partialorder %v46_v24, 8.507059e+37 }
  0xfe   :  { %v103_v15 = vpop.eup %102 }
  0xff   :  { %v38_v16 = vmul.f32 %v103_v15, %v33_v14  ;;  %vm43_vm2 = vweird.f32 %v103_v15 }
 0x100   :  { %vm44_vm4 = vmor %vm42_vm3, %vm43_vm2 }
 0x101   :  { %v39_v17 = vsub.f32 1.0, %v38_v16  ;;  %v24_v18 = vpop.xlane.xlu1 %23 }
 0x102   :  { %v34_v19 = vsub.f32 %v24_v18, %v27_v4 }
 0x103   :  { %v40_v20 = vmul.f32 %v103_v15, %v39_v17 }
 0x104   :  { %v35_v21 = vmul.f32 1.442695, %v34_v19 }
 0x105   :  { %v41_v22 = vadd.f32 %v103_v15, %v40_v20 }
 0x106   :  { %104 = vpow2.f32 %v35_v21 }
 0x107   :  { %v45_v25 = vsel %vm44_vm4, %v103_v15, %v41_v22 }
 0x108   :  { %v50_v28 = vsel %vm47_vm5, %v49_v26, %v45_v25 }
 0x10c   :  { %v105_v27 = vpop.eup %104 }
 0x10d   :  { %v51_v29 = vmul.f32 %v105_v27, %v50_v28 }
 0x10f   :  { %v52_v30 = vmax.f32 %v51_v29, 1e-07 }
 0x111   :  { %v53_v31 = vmin.f32 %v52_v30, 0.9999999 }
 0x113   :  { %106 = vlog2.f32 %v53_v31  ;;  %v54_v34 = vsub.f32 1.0, %v53_v31 }
 0x119   :  { %v107_v32 = vpop.eup %106 }
 0x11a   :  { %v56_v33 = vmul.f32 0.6931472, %v107_v32 }
 0x11c   :  { %v57_v35 = vmul.f32 -0.25, %v56_v33 }
 0x11e   :  { %v58_v36 = vmul.f32 %v57_v35, %v54_v34 }
 0x120   :  { %v59_v37 = vmul.f32 %v58_v36, %v54_v34 }
 0x122   :  { %v68_v38 = vsel %vm67_vm6, %v59_v37, 0.0 }
 0x123   :  { %69 = vadd.xlane.f32.xlu2 %v68_v38 }
 0x196   :  { %v70_v39 = vpop.xlane.xlu2 %69 }
 0x197   :  { %v71_v40 = vrot.slane %v70_v39, 4 }
 0x199   :  { %v72_v41 = vadd.f32 %v71_v40, %v70_v39 }
 0x19b   :  { %v73_v42 = vrot.slane %v72_v41, 2 }
 0x19d   :  { %v74_v43 = vadd.f32 %v73_v42, %v72_v41 }
 0x19f   :  { %v75_v44 = vrot.slane %v74_v43, 1 }
 0x1a1   :  { %v76_v45 = vadd.f32 %v75_v44, %v74_v43 }
 0x1a3   :  { %95 = vpush %v76_v45 }
 0x1d4   :  { %s96_s14 = spop %95 }
 0x1d5   :  { %79 = sst [smem:[#allocation2]] %s96_s14 }
 0x1d6   :  { %88 = dma.smem_to_hbm %s123_s15, 16, %s86_s13, [#allocation3]  }
 0x1d7   :  { %120 = dma.done.wait [#allocation3], 16  }
 0x1d8   :  { %121 = vsyncadd [#allocation3], 4294967280 }
 0x1d9   :  { %93 = sfence }
 0x1da   :  { %94 = vsyncpa [#allocation3], 1 }

</bundles_post_ra>
